<compile_context>
chip_gen: v7x
topology: tpu7x:2x2x1
jax: 0.10.0
libtpu: 0.0.40
codegen_flags: <defaults>
</compile_context>

<pallas_src>
import functools

import jax
import jax.numpy as jnp
from jax.experimental import pallas as pl
from jax.experimental.pallas import tpu as pltpu


def _round_up(x, m):
    return ((x + m - 1) // m) * m


def _make_kernel(sparse_rows, cont_rows, vocab_sizes, E, H1, H2):
    """Build the kernel for a static feature configuration (unrolled at trace time)."""
    S = len(sparse_rows)

    def kernel(xt_ref, ww_ref, bw_ref, *rest):
        emb_refs = rest[:S]                 # each (E, V_j)   resident f32
        w1s_refs = rest[S:2 * S]            # each (H1, E)    resident f32
        w1c_ref, b1_ref, w2t_ref, b2_ref, w3_ref, o_ref = rest[2 * S:]

        xt = xt_ref[...]                    # (F, tb) f32, batch on lanes
        tb = xt.shape[1]

        # ---- Wide path: Linear(F -> 1) + ReLU as VPU multiply + sublane reduce ----
        wide = jnp.sum(xt * ww_ref[...], axis=0, keepdims=True)          # (1, tb)
        wide = jnp.maximum(wide + bw_ref[0, 0], 0.0)

        # ---- Deep layer 1 with the embedding gather fused in-kernel ----
        # one-hot (V, tb) @ emb^T on the MXU; garbage ids on the partial tail tile
        # can never read out of bounds (it's a compare, not an index).
        h = jnp.zeros((H1, tb), jnp.float32)
        for j in range(S):
            row = sparse_rows[j]
            ids = xt[row:row + 1, :].astype(jnp.int32)                   # (1, tb)
            iota = jax.lax.broadcasted_iota(jnp.int32, (vocab_sizes[j], tb), 0)
            onehot = (iota == ids).astype(jnp.float32)                   # (V_j, tb)
            g = jnp.dot(emb_refs[j][...], onehot,
                        preferred_element_type=jnp.float32)              # (E, tb)
            h = h + jnp.dot(w1s_refs[j][...], g,
                            preferred_element_type=jnp.float32)          # (H1, tb)
        w1c = w1c_ref[...]                                               # (H1, C)
        for ci, row in enumerate(cont_rows):
            h = h + w1c[:, ci:ci + 1] * xt[row:row + 1, :]               # (H1,1)*(1,tb)
        h = jnp.maximum(h + b1_ref[...], 0.0)

        # ---- Deep layer 2 ----
        h = jnp.dot(w2t_ref[...], h, preferred_element_type=jnp.float32)  # (H2, tb)
        h = jnp.maximum(h + b2_ref[...], 0.0)

        # ---- dnn_linear (H2 -> 1, no bias): multiply + sublane reduce ----
        dnn_logit = jnp.sum(h * w3_ref[...], axis=0, keepdims=True)       # (1, tb)

        logit = wide + dnn_logit
        # Exact sigmoid; epilogue is only (1, tb) so the divide cost is negligible.
        o_ref[...] = 1.0 / (1.0 + jnp.exp(-logit))

    return kernel


@functools.partial(jax.jit, static_argnames=("sparse_idx", "cont_idx", "block_b"))
def wide_deep_forward(X, params, sparse_idx, cont_idx, block_b=8192):
    """X: (B, F) float32; sparse columns hold integer ids stored as floats."""
    B, F = X.shape
    S, C = len(sparse_idx), len(cont_idx)
    E = params["emb"][0].shape[1]
    H1 = params["w1"].shape[1]
    H2 = params["w2"].shape[1]
    vocab_sizes = tuple(int(t.shape[0]) for t in params["emb"])

    # ---- batch tile on the lane axis ----
    # Large tiles amortize the ~0.35us/grid-step overhead; cap so >=4 grid steps
    # remain (v7x: two TensorCores need work to split) once B is large enough.
    tb = max(128, min(block_b, _round_up(pl.cdiv(B, 4), 128)))

    # TODO(synk): have the caller supply X pre-transposed to drop this HBM pass.
    x_t = X.T.astype(jnp.float32)                                    # (F, B)
    b_eff = B
    if B < tb:                        # only tiny batches pad (one tile); large B uses
        x_t = jnp.pad(x_t, ((0, 0), (0, tb - B)))                    # partial last tile
        b_eff = tb
    grid = (pl.cdiv(b_eff, tb),)

    # ---- weights, pre-transposed so the kernel never relayouts; all f32 ----
    ww = params["ww"].astype(jnp.float32)                            # (F, 1)
    bw = params["bw"].reshape(1, 1).astype(jnp.float32)              # scalar -> SMEM
    W1 = params["w1"].astype(jnp.float32)                            # (D_in, H1)
    embT = [params["emb"][j].T.astype(jnp.float32) for j in range(S)]    # (E, V_j)
    w1sT = [W1[j * E:(j + 1) * E, :].T for j in range(S)]                # (H1, E)
    w1cT = (W1[S * E:S * E + C, :].T if C > 0
            else jnp.zeros((H1, 1), jnp.float32))                        # (H1, C)
    b1 = params["b1"].reshape(-1, 1).astype(jnp.float32)             # (H1, 1)
    w2T = params["w2"].T.astype(jnp.float32)                         # (H2, H1)
    b2 = params["b2"].reshape(-1, 1).astype(jnp.float32)             # (H2, 1)
    w3 = params["w3"].astype(jnp.float32)                            # (H2, 1)

    kernel = _make_kernel(tuple(sparse_idx), tuple(cont_idx), vocab_sizes, E, H1, H2)

    def resident(shape):
        return pl.BlockSpec(shape, lambda i: (0, 0))

    in_specs = [
        pl.BlockSpec((F, tb), lambda i: (0, i)),                     # X^T tile (only stream)
        resident((F, 1)),                                            # ww
        pl.BlockSpec((1, 1), lambda i: (0, 0),
                     memory_space=pltpu.MemorySpace.SMEM),           # bw scalar
    ]
    in_specs += [resident((E, v)) for v in vocab_sizes]              # emb_j^T (resident)
    in_specs += [resident((H1, E)) for _ in range(S)]                # W1_j^T sparse slices
    in_specs += [
        resident(tuple(w1cT.shape)),                                 # W1_cont^T
        resident((H1, 1)),                                           # b1
        resident((H2, H1)),                                          # W2^T
        resident((H2, 1)),                                           # b2
        resident((H2, 1)),                                           # w3
    ]

    # Advisory cost: memory-bound custom call (streamed X^T + output + tiny weights).
    gather_flops = sum(2 * B * v * E for v in vocab_sizes)
    flops = gather_flops + 2 * B * (F + S * E * H1 + C * H1 + H1 * H2 + H2)
    weight_bytes = sum(int(a.size) * 4
                       for a in [ww, bw, w1cT, b1, w2T, b2, w3] + embT + w1sT)
    cost = pl.CostEstimate(flops=int(flops), transcendentals=int(B),
                           bytes_accessed=int(x_t.size * 4 + b_eff * 4 + weight_bytes))

    out = pl.pallas_call(
        kernel,
        out_shape=jax.ShapeDtypeStruct((1, b_eff), jnp.float32),
        grid=grid,
        in_specs=in_specs,
        out_specs=pl.BlockSpec((1, tb), lambda i: (0, i)),           # lane-dense output slab
        compiler_params=pltpu.CompilerParams(
            dimension_semantics=("parallel",),                       # shard batch tiles across TCs
            vmem_limit_bytes=32 * 1024 * 1024,                       # fits v5e/v6e/v7x budgets
        ),
        cost_estimate=cost,
    )(x_t, ww, bw, *embT, *w1sT, w1cT, b1, w2T, b2, w3)

    return out[0, :B].reshape(B, 1)


def reference_forward(X, params, sparse_idx, cont_idx):
    """Pure-JAX f32 reference mirroring the PyTorch forward (eval mode)."""
    sparse_embs = [params["emb"][j][X[:, c].astype(jnp.int32)]
                   for j, c in enumerate(sparse_idx)]
    cont = [X[:, c][:, None] for c in cont_idx]
    dnn_input = jnp.concatenate(sparse_embs + cont, axis=1)

    wide = jnp.maximum(X @ params["ww"] + params["bw"], 0.0)
    h = jnp.maximum(dnn_input @ params["w1"] + params["b1"], 0.0)
    h = jnp.maximum(h @ params["w2"] + params["b2"], 0.0)
    logit = wide + h @ params["w3"]
    return jax.nn.sigmoid(logit)


if __name__ == "__main__":
    # Small synthetic configuration consistent with the module:
    #   3 sparse features, 2 continuous, embedding_size=4, dnn_hidden_units=(32,16)
    B = 8
    E = 4
    H1, H2 = 32, 16
    vocab_sizes = [10, 12, 8]
    sparse_idx = (0, 1, 2)
    cont_idx = (3, 4)
    F = len(sparse_idx) + len(cont_idx)
    D_in = len(sparse_idx) * E + len(cont_idx)

    key = jax.random.PRNGKey(0)
    keys = jax.random.split(key, 12)

    params = {
        "ww": 0.01 * jax.random.normal(keys[0], (F, 1), jnp.float32),
        "bw": 0.01 * jax.random.normal(keys[1], (1, 1), jnp.float32),
        "w1": 0.05 * jax.random.normal(keys[2], (D_in, H1), jnp.float32),
        "b1": 0.01 * jax.random.normal(keys[3], (1, H1), jnp.float32),
        "w2": 0.05 * jax.random.normal(keys[4], (H1, H2), jnp.float32),
        "b2": 0.01 * jax.random.normal(keys[5], (1, H2), jnp.float32),
        "w3": 0.1 * jax.random.normal(keys[6], (H2, 1), jnp.float32),
        "emb": [jax.random.normal(keys[7 + j], (vocab_sizes[j], E), jnp.float32)
                for j in range(len(vocab_sizes))],
    }

    # X: sparse columns carry integer ids (stored as float), continuous columns floats.
    kx1, kx2 = jax.random.split(keys[10])
    sparse_cols = [jax.random.randint(jax.random.fold_in(kx1, j), (B,), 0, vocab_sizes[j])
                   .astype(jnp.float32) for j in range(len(vocab_sizes))]
    cont_cols = jax.random.normal(kx2, (B, len(cont_idx)), jnp.float32)
    X = jnp.concatenate([jnp.stack(sparse_cols, axis=1), cont_cols], axis=1)  # (B, F)

    y = wide_deep_forward(X, params, sparse_idx, cont_idx)
    y = jax.block_until_ready(y)

    y_ref = reference_forward(X, params, sparse_idx, cont_idx)
    assert y.shape == (B, 1)
    assert jnp.allclose(y, y_ref, atol=2e-3, rtol=2e-3), "mismatch vs reference"

    print("KERNEL_OK")
</pallas_src>

<mosaic_0001>
module attributes {stable_mosaic.version = 11 : i64} {
  func.func @kernel(%arg0: i32, %arg1: memref<5x128xf32, #tpu.memory_space<vmem>>, %arg2: memref<5x1xf32, #tpu.memory_space<vmem>>, %arg3: memref<1x1xf32, #tpu.memory_space<smem>>, %arg4: memref<4x10xf32, #tpu.memory_space<vmem>>, %arg5: memref<4x12xf32, #tpu.memory_space<vmem>>, %arg6: memref<4x8xf32, #tpu.memory_space<vmem>>, %arg7: memref<32x4xf32, #tpu.memory_space<vmem>>, %arg8: memref<32x4xf32, #tpu.memory_space<vmem>>, %arg9: memref<32x4xf32, #tpu.memory_space<vmem>>, %arg10: memref<32x2xf32, #tpu.memory_space<vmem>>, %arg11: memref<32x1xf32, #tpu.memory_space<vmem>>, %arg12: memref<16x32xf32, #tpu.memory_space<vmem>>, %arg13: memref<16x1xf32, #tpu.memory_space<vmem>>, %arg14: memref<16x1xf32, #tpu.memory_space<vmem>>, %arg15: memref<1x128xf32, #tpu.memory_space<vmem>>) attributes {dimension_semantics = [#tpu.dimension_semantics<parallel>], iteration_bounds = array<i64: 1>, scalar_prefetch = 0 : i64, scratch_operands = 0 : i64, tpu.core_type = #tpu.core_type<tc>, window_params = [{transform_indices = @transform_0, window_bounds = array<i64: 5, 128>}, {pipeline_mode = #tpu.pipeline_mode<synchronous>, transform_indices = @transform_1, window_bounds = array<i64: 5, 1>}, {transform_indices = @transform_2, window_bounds = array<i64: 1, 1>}, {pipeline_mode = #tpu.pipeline_mode<synchronous>, transform_indices = @transform_3, window_bounds = array<i64: 4, 10>}, {pipeline_mode = #tpu.pipeline_mode<synchronous>, transform_indices = @transform_4, window_bounds = array<i64: 4, 12>}, {pipeline_mode = #tpu.pipeline_mode<synchronous>, transform_indices = @transform_5, window_bounds = array<i64: 4, 8>}, {pipeline_mode = #tpu.pipeline_mode<synchronous>, transform_indices = @transform_6, window_bounds = array<i64: 32, 4>}, {pipeline_mode = #tpu.pipeline_mode<synchronous>, transform_indices = @transform_7, window_bounds = array<i64: 32, 4>}, {pipeline_mode = #tpu.pipeline_mode<synchronous>, transform_indices = @transform_8, window_bounds = array<i64: 32, 4>}, {pipeline_mode = #tpu.pipeline_mode<synchronous>, transform_indices = @transform_9, window_bounds = array<i64: 32, 2>}, {pipeline_mode = #tpu.pipeline_mode<synchronous>, transform_indices = @transform_10, window_bounds = array<i64: 32, 1>}, {pipeline_mode = #tpu.pipeline_mode<synchronous>, transform_indices = @transform_11, window_bounds = array<i64: 16, 32>}, {pipeline_mode = #tpu.pipeline_mode<synchronous>, transform_indices = @transform_12, window_bounds = array<i64: 16, 1>}, {pipeline_mode = #tpu.pipeline_mode<synchronous>, transform_indices = @transform_13, window_bounds = array<i64: 16, 1>}, {transform_indices = @transform_14, window_bounds = array<i64: 1, 128>}]} {
    %c0 = arith.constant 0 : index
    %c0_0 = arith.constant 0 : index
    %0 = vector.load %arg1[%c0, %c0_0] : memref<5x128xf32, #tpu.memory_space<vmem>>, vector<5x128xf32>
    %c0_1 = arith.constant 0 : index
    %c0_2 = arith.constant 0 : index
    %1 = vector.load %arg2[%c0_1, %c0_2] : memref<5x1xf32, #tpu.memory_space<vmem>>, vector<5x1xf32>
    %2 = vector.broadcast %1 : vector<5x1xf32> to vector<5x128xf32>
    %3 = arith.mulf %0, %2 : vector<5x128xf32>
    %cst = arith.constant dense<0.000000e+00> : vector<128xf32>
    %4 = vector.multi_reduction <add>, %3, %cst [0] : vector<5x128xf32> to vector<128xf32>
    %5 = vector.shape_cast %4 : vector<128xf32> to vector<1x128xf32>
    %c0_3 = arith.constant 0 : index
    %c0_4 = arith.constant 0 : index
    %6 = memref.load %arg3[%c0_3, %c0_4] : memref<1x1xf32, #tpu.memory_space<smem>>
    %7 = vector.broadcast %6 : f32 to vector<1x128xf32>
    %8 = arith.addf %5, %7 : vector<1x128xf32>
    %cst_5 = arith.constant 0.000000e+00 : f32
    %9 = vector.broadcast %cst_5 : f32 to vector<1x128xf32>
    %10 = arith.maximumf %8, %9 : vector<1x128xf32>
    %cst_6 = arith.constant 0.000000e+00 : f32
    %11 = vector.broadcast %cst_6 : f32 to vector<32x128xf32>
    %12 = vector.extract_strided_slice %0 {offsets = [0, 0], sizes = [1, 128], strides = [1, 1]} : vector<5x128xf32> to vector<1x128xf32>
    %13 = arith.fptosi %12 : vector<1x128xf32> to vector<1x128xi32>
    %14 = tpu.iota {dimensions = array<i32: 0>} : vector<10x128xi32>
    %15 = vector.broadcast %13 : vector<1x128xi32> to vector<10x128xi32>
    %16 = arith.cmpi eq, %14, %15 : vector<10x128xi32>
    %17 = arith.extui %16 : vector<10x128xi1> to vector<10x128xi32>
    %18 = arith.sitofp %17 : vector<10x128xi32> to vector<10x128xf32>
    %c0_7 = arith.constant 0 : index
    %c0_8 = arith.constant 0 : index
    %19 = vector.load %arg4[%c0_7, %c0_8] : memref<4x10xf32, #tpu.memory_space<vmem>>, vector<4x10xf32>
    %cst_9 = arith.constant dense<0.000000e+00> : vector<4x128xf32>
    %20 = tpu.matmul %19, %18, %cst_9 {dimension_numbers = #tpu.dot_dimension_numbers<[1], [0], [0], [1], [0, 0, 1, 1], [], []>} : vector<4x10xf32>, vector<10x128xf32>, vector<4x128xf32> -> vector<4x128xf32>
    %c0_10 = arith.constant 0 : index
    %c0_11 = arith.constant 0 : index
    %21 = vector.load %arg7[%c0_10, %c0_11] : memref<32x4xf32, #tpu.memory_space<vmem>>, vector<32x4xf32>
    %cst_12 = arith.constant dense<0.000000e+00> : vector<32x128xf32>
    %22 = tpu.matmul %21, %20, %cst_12 {dimension_numbers = #tpu.dot_dimension_numbers<[1], [0], [0], [1], [0, 0, 1, 1], [], []>} : vector<32x4xf32>, vector<4x128xf32>, vector<32x128xf32> -> vector<32x128xf32>
    %23 = arith.addf %11, %22 : vector<32x128xf32>
    %24 = vector.extract_strided_slice %0 {offsets = [1, 0], sizes = [1, 128], strides = [1, 1]} : vector<5x128xf32> to vector<1x128xf32>
    %25 = arith.fptosi %24 : vector<1x128xf32> to vector<1x128xi32>
    %26 = tpu.iota {dimensions = array<i32: 0>} : vector<12x128xi32>
    %27 = vector.broadcast %25 : vector<1x128xi32> to vector<12x128xi32>
    %28 = arith.cmpi eq, %26, %27 : vector<12x128xi32>
    %29 = arith.extui %28 : vector<12x128xi1> to vector<12x128xi32>
    %30 = arith.sitofp %29 : vector<12x128xi32> to vector<12x128xf32>
    %c0_13 = arith.constant 0 : index
    %c0_14 = arith.constant 0 : index
    %31 = vector.load %arg5[%c0_13, %c0_14] : memref<4x12xf32, #tpu.memory_space<vmem>>, vector<4x12xf32>
    %cst_15 = arith.constant dense<0.000000e+00> : vector<4x128xf32>
    %32 = tpu.matmul %31, %30, %cst_15 {dimension_numbers = #tpu.dot_dimension_numbers<[1], [0], [0], [1], [0, 0, 1, 1], [], []>} : vector<4x12xf32>, vector<12x128xf32>, vector<4x128xf32> -> vector<4x128xf32>
    %c0_16 = arith.constant 0 : index
    %c0_17 = arith.constant 0 : index
    %33 = vector.load %arg8[%c0_16, %c0_17] : memref<32x4xf32, #tpu.memory_space<vmem>>, vector<32x4xf32>
    %cst_18 = arith.constant dense<0.000000e+00> : vector<32x128xf32>
    %34 = tpu.matmul %33, %32, %cst_18 {dimension_numbers = #tpu.dot_dimension_numbers<[1], [0], [0], [1], [0, 0, 1, 1], [], []>} : vector<32x4xf32>, vector<4x128xf32>, vector<32x128xf32> -> vector<32x128xf32>
    %35 = arith.addf %23, %34 : vector<32x128xf32>
    %36 = vector.extract_strided_slice %0 {offsets = [2, 0], sizes = [1, 128], strides = [1, 1]} : vector<5x128xf32> to vector<1x128xf32>
    %37 = arith.fptosi %36 : vector<1x128xf32> to vector<1x128xi32>
    %38 = tpu.iota {dimensions = array<i32: 0>} : vector<8x128xi32>
    %39 = vector.broadcast %37 : vector<1x128xi32> to vector<8x128xi32>
    %40 = arith.cmpi eq, %38, %39 : vector<8x128xi32>
    %41 = arith.extui %40 : vector<8x128xi1> to vector<8x128xi32>
    %42 = arith.sitofp %41 : vector<8x128xi32> to vector<8x128xf32>
    %c0_19 = arith.constant 0 : index
    %c0_20 = arith.constant 0 : index
    %43 = vector.load %arg6[%c0_19, %c0_20] : memref<4x8xf32, #tpu.memory_space<vmem>>, vector<4x8xf32>
    %cst_21 = arith.constant dense<0.000000e+00> : vector<4x128xf32>
    %44 = tpu.matmul %43, %42, %cst_21 {dimension_numbers = #tpu.dot_dimension_numbers<[1], [0], [0], [1], [0, 0, 1, 1], [], []>} : vector<4x8xf32>, vector<8x128xf32>, vector<4x128xf32> -> vector<4x128xf32>
    %c0_22 = arith.constant 0 : index
    %c0_23 = arith.constant 0 : index
    %45 = vector.load %arg9[%c0_22, %c0_23] : memref<32x4xf32, #tpu.memory_space<vmem>>, vector<32x4xf32>
    %cst_24 = arith.constant dense<0.000000e+00> : vector<32x128xf32>
    %46 = tpu.matmul %45, %44, %cst_24 {dimension_numbers = #tpu.dot_dimension_numbers<[1], [0], [0], [1], [0, 0, 1, 1], [], []>} : vector<32x4xf32>, vector<4x128xf32>, vector<32x128xf32> -> vector<32x128xf32>
    %47 = arith.addf %35, %46 : vector<32x128xf32>
    %c0_25 = arith.constant 0 : index
    %c0_26 = arith.constant 0 : index
    %48 = vector.load %arg10[%c0_25, %c0_26] : memref<32x2xf32, #tpu.memory_space<vmem>>, vector<32x2xf32>
    %49 = vector.extract_strided_slice %48 {offsets = [0, 0], sizes = [32, 1], strides = [1, 1]} : vector<32x2xf32> to vector<32x1xf32>
    %50 = vector.extract_strided_slice %0 {offsets = [3, 0], sizes = [1, 128], strides = [1, 1]} : vector<5x128xf32> to vector<1x128xf32>
    %51 = vector.broadcast %49 : vector<32x1xf32> to vector<32x128xf32>
    %52 = vector.broadcast %50 : vector<1x128xf32> to vector<32x128xf32>
    %53 = arith.mulf %51, %52 : vector<32x128xf32>
    %54 = arith.addf %47, %53 : vector<32x128xf32>
    %55 = vector.extract_strided_slice %48 {offsets = [0, 1], sizes = [32, 1], strides = [1, 1]} : vector<32x2xf32> to vector<32x1xf32>
    %56 = vector.extract_strided_slice %0 {offsets = [4, 0], sizes = [1, 128], strides = [1, 1]} : vector<5x128xf32> to vector<1x128xf32>
    %57 = vector.broadcast %55 : vector<32x1xf32> to vector<32x128xf32>
    %58 = vector.broadcast %56 : vector<1x128xf32> to vector<32x128xf32>
    %59 = arith.mulf %57, %58 : vector<32x128xf32>
    %60 = arith.addf %54, %59 : vector<32x128xf32>
    %c0_27 = arith.constant 0 : index
    %c0_28 = arith.constant 0 : index
    %61 = vector.load %arg11[%c0_27, %c0_28] : memref<32x1xf32, #tpu.memory_space<vmem>>, vector<32x1xf32>
    %62 = vector.broadcast %61 : vector<32x1xf32> to vector<32x128xf32>
    %63 = arith.addf %60, %62 : vector<32x128xf32>
    %cst_29 = arith.constant 0.000000e+00 : f32
    %64 = vector.broadcast %cst_29 : f32 to vector<32x128xf32>
    %65 = arith.maximumf %63, %64 : vector<32x128xf32>
    %c0_30 = arith.constant 0 : index
    %c0_31 = arith.constant 0 : index
    %66 = vector.load %arg12[%c0_30, %c0_31] : memref<16x32xf32, #tpu.memory_space<vmem>>, vector<16x32xf32>
    %cst_32 = arith.constant dense<0.000000e+00> : vector<16x128xf32>
    %67 = tpu.matmul %66, %65, %cst_32 {dimension_numbers = #tpu.dot_dimension_numbers<[1], [0], [0], [1], [0, 0, 1, 1], [], []>} : vector<16x32xf32>, vector<32x128xf32>, vector<16x128xf32> -> vector<16x128xf32>
    %c0_33 = arith.constant 0 : index
    %c0_34 = arith.constant 0 : index
    %68 = vector.load %arg13[%c0_33, %c0_34] : memref<16x1xf32, #tpu.memory_space<vmem>>, vector<16x1xf32>
    %69 = vector.broadcast %68 : vector<16x1xf32> to vector<16x128xf32>
    %70 = arith.addf %67, %69 : vector<16x128xf32>
    %cst_35 = arith.constant 0.000000e+00 : f32
    %71 = vector.broadcast %cst_35 : f32 to vector<16x128xf32>
    %72 = arith.maximumf %70, %71 : vector<16x128xf32>
    %c0_36 = arith.constant 0 : index
    %c0_37 = arith.constant 0 : index
    %73 = vector.load %arg14[%c0_36, %c0_37] : memref<16x1xf32, #tpu.memory_space<vmem>>, vector<16x1xf32>
    %74 = vector.broadcast %73 : vector<16x1xf32> to vector<16x128xf32>
    %75 = arith.mulf %72, %74 : vector<16x128xf32>
    %cst_38 = arith.constant dense<0.000000e+00> : vector<128xf32>
    %76 = vector.multi_reduction <add>, %75, %cst_38 [0] : vector<16x128xf32> to vector<128xf32>
    %77 = vector.shape_cast %76 : vector<128xf32> to vector<1x128xf32>
    %78 = arith.addf %10, %77 : vector<1x128xf32>
    %cst_39 = arith.constant 0.000000e+00 : f32
    %79 = vector.broadcast %cst_39 : f32 to vector<1x128xf32>
    %80 = arith.subf %79, %78 : vector<1x128xf32>
    %81 = math.exp %80 : vector<1x128xf32>
    %cst_40 = arith.constant 1.000000e+00 : f32
    %82 = vector.broadcast %cst_40 : f32 to vector<1x128xf32>
    %83 = arith.addf %82, %81 : vector<1x128xf32>
    %cst_41 = arith.constant 1.000000e+00 : f32
    %84 = vector.broadcast %cst_41 : f32 to vector<1x128xf32>
    %85 = arith.divf %84, %83 : vector<1x128xf32>
    %c0_42 = arith.constant 0 : index
    %c0_43 = arith.constant 0 : index
    %86 = vector.load %arg15[%c0_42, %c0_43] : memref<1x128xf32, #tpu.memory_space<vmem>>, vector<1x128xf32>
    tpu.vector_store %arg15[%c0_42, %c0_43], %85 {strides = array<i32>} : memref<1x128xf32, #tpu.memory_space<vmem>>, vector<1x128xf32>,
    return
  }
  func.func @transform_0(%arg0: i32) -> (i32, i32) {
    %c0_i32 = arith.constant 0 : i32
    %c0_i32_0 = arith.constant 0 : i32
    return %c0_i32, %arg0 : i32, i32
  }
  func.func @transform_1(%arg0: i32) -> (i32, i32) {
    %c0_i32 = arith.constant 0 : i32
    %c0_i32_0 = arith.constant 0 : i32
    %c0_i32_1 = arith.constant 0 : i32
    return %c0_i32, %c0_i32_0 : i32, i32
  }
  func.func @transform_2(%arg0: i32) -> (i32, i32) {
    %c0_i32 = arith.constant 0 : i32
    %c0_i32_0 = arith.constant 0 : i32
    %c0_i32_1 = arith.constant 0 : i32
    return %c0_i32, %c0_i32_0 : i32, i32
  }
  func.func @transform_3(%arg0: i32) -> (i32, i32) {
    %c0_i32 = arith.constant 0 : i32
    %c0_i32_0 = arith.constant 0 : i32
    %c0_i32_1 = arith.constant 0 : i32
    return %c0_i32, %c0_i32_0 : i32, i32
  }
  func.func @transform_4(%arg0: i32) -> (i32, i32) {
    %c0_i32 = arith.constant 0 : i32
    %c0_i32_0 = arith.constant 0 : i32
    %c0_i32_1 = arith.constant 0 : i32
    return %c0_i32, %c0_i32_0 : i32, i32
  }
  func.func @transform_5(%arg0: i32) -> (i32, i32) {
    %c0_i32 = arith.constant 0 : i32
    %c0_i32_0 = arith.constant 0 : i32
    %c0_i32_1 = arith.constant 0 : i32
    return %c0_i32, %c0_i32_0 : i32, i32
  }
  func.func @transform_6(%arg0: i32) -> (i32, i32) {
    %c0_i32 = arith.constant 0 : i32
    %c0_i32_0 = arith.constant 0 : i32
    %c0_i32_1 = arith.constant 0 : i32
    return %c0_i32, %c0_i32_0 : i32, i32
  }
  func.func @transform_7(%arg0: i32) -> (i32, i32) {
    %c0_i32 = arith.constant 0 : i32
    %c0_i32_0 = arith.constant 0 : i32
    %c0_i32_1 = arith.constant 0 : i32
    return %c0_i32, %c0_i32_0 : i32, i32
  }
  func.func @transform_8(%arg0: i32) -> (i32, i32) {
    %c0_i32 = arith.constant 0 : i32
    %c0_i32_0 = arith.constant 0 : i32
    %c0_i32_1 = arith.constant 0 : i32
    return %c0_i32, %c0_i32_0 : i32, i32
  }
  func.func @transform_9(%arg0: i32) -> (i32, i32) {
    %c0_i32 = arith.constant 0 : i32
    %c0_i32_0 = arith.constant 0 : i32
    %c0_i32_1 = arith.constant 0 : i32
    return %c0_i32, %c0_i32_0 : i32, i32
  }
  func.func @transform_10(%arg0: i32) -> (i32, i32) {
    %c0_i32 = arith.constant 0 : i32
    %c0_i32_0 = arith.constant 0 : i32
    %c0_i32_1 = arith.constant 0 : i32
    return %c0_i32, %c0_i32_0 : i32, i32
  }
  func.func @transform_11(%arg0: i32) -> (i32, i32) {
    %c0_i32 = arith.constant 0 : i32
    %c0_i32_0 = arith.constant 0 : i32
    %c0_i32_1 = arith.constant 0 : i32
    return %c0_i32, %c0_i32_0 : i32, i32
  }
  func.func @transform_12(%arg0: i32) -> (i32, i32) {
    %c0_i32 = arith.constant 0 : i32
    %c0_i32_0 = arith.constant 0 : i32
    %c0_i32_1 = arith.constant 0 : i32
    return %c0_i32, %c0_i32_0 : i32, i32
  }
  func.func @transform_13(%arg0: i32) -> (i32, i32) {
    %c0_i32 = arith.constant 0 : i32
    %c0_i32_0 = arith.constant 0 : i32
    %c0_i32_1 = arith.constant 0 : i32
    return %c0_i32, %c0_i32_0 : i32, i32
  }
  func.func @transform_14(%arg0: i32) -> (i32, i32) {
    %c0_i32 = arith.constant 0 : i32
    %c0_i32_0 = arith.constant 0 : i32
    return %c0_i32, %arg0 : i32, i32
  }
}

</mosaic_0001>

<bundles_post_ra>
// kernel: wide_deep_forward.1
= control target key start
LH: loop header
LB: loop body
LE: loop exit
PB: predicated region body
PF: predicated region fallthrough
CT: control target
= control target key end

     0   :  { %v69_v0 = vlaneseq  ;;  %v1031_v1 = vmov 0.0|0.0   ;;  %vm1032_vm0 = vmmov 0   ;;  %v1033_v5 = vmov 0.0   ;;  %s1252_s0 = inlined_call_operand.vmem [shape: f32[5,128], index: 0, kind: input, shape index: {}]   ;;  %s1253_s4 = inlined_call_operand.vmem [shape: f32[4,12], index: 4, kind: input, shape index: {}]   ;;  %s1254_s3 = inlined_call_operand.vmem [shape: f32[4,10], index: 3, kind: input, shape index: {}]   ;;  %s1255_s5 = inlined_call_operand.vmem [shape: f32[4,8], index: 5, kind: input, shape index: {}]   ;;  %s1256_s7 = inlined_call_operand.vmem [shape: f32[32,4], index: 7, kind: input, shape index: {}]   ;;  %s1257_s8 = inlined_call_operand.vmem [shape: f32[32,4], index: 8, kind: input, shape index: {}]   ;;  %s1258_s9 = inlined_call_operand.vmem [shape: f32[32,2], index: 9, kind: input, shape index: {}]   ;;  %s1259_s10 = inlined_call_operand.vmem [shape: f32[32,1], index: 10, kind: input, shape index: {}]   ;;  %s1260_s12 = inlined_call_operand.vmem [shape: f32[16,1], index: 12, kind: input, shape index: {}]   ;;  %s1261_s1 = inlined_call_operand.vmem [shape: f32[5,1], index: 1, kind: input, shape index: {}]   ;;  %s1262_s13 = inlined_call_operand.vmem [shape: f32[16,1], index: 13, kind: input, shape index: {}]   ;;  %s1263_s6 = inlined_call_operand.vmem [shape: f32[32,4], index: 6, kind: input, shape index: {}]   ;;  %s1264_s11 = inlined_call_operand.vmem [shape: f32[16,32], index: 11, kind: input, shape index: {}]   ;;  %s1265_s2 = inlined_call_operand.<no memory space> [shape: f32[1,1], index: 2, kind: input, shape index: {}]   ;;  %s1266_s14 = inlined_call_operand.vmem [shape: f32[1,128], index: 14, kind: output, shape index: {}]  }
   0x1   :  { %993 = vmatprep.subr.bf16.mxu1 %v1031_v1  ;;  %v1115_v2 = vld [vmem:[%s1252_s0] sm:$0x1f]  ;;  %989 = vmatprep.subr.bf16.mxu0 %v1031_v1  ;;  %vm180_vm1 = vcmask 1043456   ;;  %vm87_vm2 = vcmask 1041408   ;;  %v1034_v16 = vmov 1.0   ;;  %vm176_vm9 = vcmask 97280  }
   0x2   :  { %v1013_v3 = vtrunc.f32 %v1115_v2  ;;  %v1118_v4 = vshrl.u32 %v69_v0, 7  ;;  %946 = vmatprep.mubr.msk.f32.mxu1 %vm1032_vm0, %v1033_v5  ;;  %939 = vmatprep.mubr.msk.f32.mxu0 %vm1032_vm0, %v1033_v5  ;;  %v175_v19 = vld [vmem:[%s1253_s4] sm:$0xf]  ;;  %vm83_vm10 = vcmask 80896   ;;  %vm467_vm12 = vcmask 64512   ;;  %v651_v25 = vld [vmem:[%s1258_s9 + $0x10] sm:$0xff] }
   0x3   :  { %v82_v20 = vld [vmem:[%s1254_s3] sm:$0xf]  ;;  %vm258_vm13 = vcmask 31744   ;;  %v1035_v24 = vmov 1   ;;  %v650_v27 = vld [vmem:[%s1258_s9 + $0x8] sm:$0xff]  ;;  %v1036_v28 = vmov 0  }
   0x4   :  { %v1014_v6 = vcvt.f32.s32 %v1013_v3  ;;  %v71_v7 = vadd.s32 8, %v1118_v4  ;;  %v167_v8 = vsub.s32 1, %v1118_v4  ;;  %v74_v9 = vsub.s32 0, %v1118_v4  ;;  %v466_v21 = vld [vmem:[%s1255_s5] sm:$0xf]  ;;  %1023 = vset.pattern.permute.xlu0 %v1035_v24  ;;  %1021 = vset.pattern.permute.xlu1 %v1035_v24  ;;  %v652_v29 = vld [vmem:[%s1258_s9 + $0x18] sm:$0xff] }
   0x5   :  { %v461_v10 = vsub.s32 2, %v1118_v4  ;;  %v254_v22 = vld [vmem:[%s1256_s7] sm:$0xff]  ;;  %694 = vperm.xlu0 %1023, %v651_v25   ;;  %v714_v30 = vld [vmem:[%s1259_s10 + $0x8] sm:$0xff]  ;;  %v715_v33 = vld [vmem:[%s1259_s10 + $0x10] sm:$0xff]  ;;  %vm759_vm14 = vcmask 261120   ;;  %v703_v63 = vsub.s32 4, %v1118_v4 }
   0x6   :  { %v168_v11 = vrot.slane %v1014_v6, %v167_v8  ;;  %v75_v12 = vrot.slane %v1014_v6, %v74_v9  ;;  %v541_v23 = vld [vmem:[%s1257_s8] sm:$0xff]  ;;  %v716_v35 = vld [vmem:[%s1259_s10 + $0x18] sm:$0xff]  ;;  %v844_v36 = vld [vmem:[%s1262_s13 + $0x8] sm:$0xff]  ;;  %v675_v0 = vsub.s32 3, %v1118_v4  ;;  %vm56_vm15 = vcmask 1044480  }
   0x7   :  { %v462_v15 = vrot.slane %v1014_v6, %v461_v10  ;;  %v649_v26 = vld [vmem:[%s1258_s9] sm:$0xff]  ;;  %v748_v37 = vld [vmem:[%s1260_s12 + $0x8] sm:$0xff]  ;;  %v256_v44 = vld [vmem:[%s1256_s7 + $0x10] sm:$0xff]  ;;  %v704_v6 = vrot.slane %v1115_v2, %v703_v63 }
   0x8   :  { %vm169_vm3 = vcmp.eq.s32.totalorder %v1118_v4, %v168_v11  ;;  %vm170_vm4 = vcmp.eq.s32.totalorder %v71_v7, %v168_v11  ;;  %vm76_vm5 = vcmp.eq.s32.totalorder %v1118_v4, %v75_v12  ;;  %vm77_vm6 = vcmp.eq.s32.totalorder %v71_v7, %v75_v12  ;;  %686 = vperm.xlu1 %1021, %v649_v26   ;;  %v713_v31 = vld [vmem:[%s1259_s10] sm:$0xff]  ;;  %v255_v41 = vld [vmem:[%s1256_s7 + $0x8] sm:$0xff]  ;;  %v257_v45 = vld [vmem:[%s1256_s7 + $0x18] sm:$0xff] }
   0x9   :  { %v882_v13 = vsel %vm170_vm4, 1.0, %v1033_v5  ;;  %vm995_vm7 = vmpackc.low %vm180_vm1, %vm169_vm3  ;;  %v877_v14 = vsel %vm77_vm6, 1.0, %v1033_v5  ;;  %vm463_vm11 = vcmp.eq.s32.totalorder %v1118_v4, %v462_v15  ;;  %1024 = vset.pattern.permute.xlu0 %v1036_v28  ;;  %v747_v32 = vld [vmem:[%s1260_s12] sm:$0xff]  ;;  %v542_v47 = vld [vmem:[%s1257_s8 + $0x8] sm:$0xff]  ;;  %v676_v7 = vrot.slane %v1115_v2, %v675_v0 }
   0xa   :  { %v994_v17 = vpack.c.bf16 %v882_v13, %v1034_v16  ;;  %v990_v18 = vpack.c.bf16 %v877_v14, %v1034_v16  ;;  %vm991_vm8 = vmpackc.low %vm87_vm2, %vm76_vm5  ;;  %655 = vperm.xlu0 %1024, %v649_v26   ;;  %v49_v34 = vld [vmem:[%s1261_s1] sm:$0x1f]  ;;  %v543_v50 = vld [vmem:[%s1257_s8 + $0x10] sm:$0xff] }
   0xb   :  { %v843_v38 = vld [vmem:[%s1262_s13] sm:$0xff]  ;;  %v162_v51 = vld [vmem:[%s1263_s6 + $0x8] sm:$0xff]  ;;  %v544_v52 = vld [vmem:[%s1257_s8 + $0x18] sm:$0xff] }
   0xc   :  { %996 = vmatpush3.bf16.msk.msra.mxu1 %vm995_vm7, %v994_v17  ;;  %992 = vmatpush3.bf16.msk.msra.mxu0 %vm991_vm8, %v990_v18  ;;  %v161_v49 = vld [vmem:[%s1263_s6] sm:$0xff]  ;;  %v163_v53 = vld [vmem:[%s1263_s6 + $0x10] sm:$0xff]  ;;  %v164_v54 = vld [vmem:[%s1263_s6 + $0x18] sm:$0xff] }
   0xd   :  { %965 = vmatprep.subr.mxu1 %v1033_v5  ;;  %690 = vperm.xlu1 %1021, %v650_v27   ;;  %v745_v55 = vld [vmem:[%s1264_s11] sm:$0xff] }
   0xe   :  { %660 = vperm.xlu0 %1024, %v650_v27  }
   0xf   :  { %947 = vmatmul.mubr.msk.f32.vlgmr.msra.gmra.mrb[0].mxu1 %vm176_vm9, %v175_v19  ;;  %940 = vmatmul.mubr.msk.f32.vlgmr.msra.gmra.mrb[0].mxu0 %vm83_vm10, %v82_v20 }
  0x10   :  { %966 = vmatpush3.msk.msra.mxu1 %vm463_vm11, %v1034_v16  ;;  %967 = vmatprep.mubr.msk.f32.mxu1 %vm1032_vm0, %v1033_v5 }
  0x11   :  { %951 = vmatprep.mubr.msk.f32.mxu0 %vm258_vm13, %v254_v22  ;;  %1022 = vset.pattern.permute.xlu1 %v1036_v28 }
  0x12   :  { %670 = vperm.xlu1 %1022, %v652_v29   ;;  %665 = vperm.xlu0 %1024, %v651_v25  }
  0x13   :  { %968 = vmatmul.mubr.msk.f32.vlgmr.msra.gmra.mrb[2].mxu1 %vm467_vm12, %v466_v21 }
  0x14   :  { %972 = vmatprep.mubr.msk.f32.mxu1 %vm258_vm13, %v541_v23 }
  0x16   :  { %1025 = vset.pattern.permute.xlu1 %v1035_v24  ;;  %724 = vperm.xlu0 %1024, %v714_v30  }
  0x17   :  { %698 = vperm.xlu1 %1025, %v652_v29  }
  0x1a   :  { %751 = vperm.xlu0 %1024, %v747_v32  }
  0x1b   :  { %1026 = vset.pattern.permute.xlu1 %v1036_v28 }
  0x1c   :  { %719 = vperm.xlu1 %1026, %v713_v31  }
  0x1e   :  { %52 = vperm.xlu0 %1024, %v49_v34  }
  0x20   :  { %729 = vperm.xlu1 %1026, %v715_v33  }
  0x22   :  { %852 = vperm.xlu0 %1024, %v844_v36  }
  0x24   :  { %734 = vperm.xlu1 %1026, %v716_v35  }
  0x28   :  { %756 = vperm.xlu1 %1026, %v748_v37  }
  0x2c   :  { %847 = vperm.xlu1 %1026, %v843_v38  }
  0x84   :  { %v695_v58 = vpop.permute.xlu0 %694 }
  0x85   :  { %v707_v33 = vmul.f32 %v704_v6, %v695_v58 }
  0x87   :  { %v687_v56 = vpop.permute.xlu1 %686 }
  0x88   :  { %v705_v19 = vmul.f32 %v704_v6, %v687_v56 }
  0x89   :  { %v656_v60 = vpop.permute.xlu0 %655 }
  0x8a   :  { %v677_v15 = vmul.f32 %v676_v7, %v656_v60 }
  0x8c   :  { %v691_v57 = vpop.permute.xlu1 %690 }
  0x8d   :  { %v661_v62 = vpop.permute.xlu0 %660  ;;  %v706_v17 = vmul.f32 %v704_v6, %v691_v57 }
  0x8e   :  { %v678_v11 = vmul.f32 %v676_v7, %v661_v62 }
  0x91   :  { %v671_v59 = vpop.permute.xlu1 %670  ;;  %v666_v8 = vpop.permute.xlu0 %665 }
  0x92   :  { %v680_v22 = vmul.f32 %v676_v7, %v671_v59  ;;  %v679_v26 = vmul.f32 %v676_v7, %v666_v8 }
  0x95   :  { %v725_v27 = vpop.permute.xlu0 %724 }
  0x96   :  { %v699_v61 = vpop.permute.xlu1 %698 }
  0x97   :  { %v708_v30 = vmul.f32 %v704_v6, %v699_v61 }
  0x9b   :  { %v720_v5 = vpop.permute.xlu1 %719 }
  0x9f   :  { %v730_v4 = vpop.permute.xlu1 %729 }
  0xa3   :  { %v735_v38 = vpop.permute.xlu1 %734 }
  0xe2   :  { %v250_v39 = vpop.f32.mrb[0].mxu1  ;;  %v157_v40 = vpop.f32.mrb[0].mxu0 }
  0xe3   :  { %v948_v42 = vpop.f32.mrb[1].mxu1  ;;  %949 = vmatprep.subr.msk.mxu0 %vm180_vm1, %v250_v39  ;;  %v941_v43 = vpop.f32.mrb[1].mxu0 }
  0xe4   :  { %950 = vmatpush3.msk.msra.mxu0 %vm180_vm1, %v250_v39 }
  0xe5   :  { %952 = vmatmul.mubr.msk.f32.vlgmr.msra.gmra.mrb[2].mxu0 %vm258_vm13, %v255_v41  ;;  %957 = vmatprep.subr.msk.mxu0 %vm180_vm1, %v157_v40 }
  0xe6   :  { %958 = vmatpush3.msk.msra.mxu0 %vm180_vm1, %v157_v40  ;;  %954 = vmatprep.mubr.msk.f32.mxu0 %vm258_vm13, %v256_v44  ;;  %v537_v46 = vpop.f32.mrb[2].mxu1 }
  0xe7   :  { %v969_v48 = vpop.f32.mrb[3].mxu1  ;;  %970 = vmatprep.subr.msk.mxu1 %vm180_vm1, %v537_v46 }
  0xe8   :  { %971 = vmatpush3.msk.msra.mxu1 %vm180_vm1, %v537_v46  ;;  %v752_v48 = vpop.permute.xlu0 %751 }
  0xe9   :  { %955 = vmatmul.mubr.msk.f32.gmra.mrb[4].mxu0 %vm258_vm13, %v257_v45  ;;  %973 = vmatmul.mubr.msk.f32.vlgmr.msra.gmra.mrb[4].mxu1 %vm258_vm13, %v542_v47  ;;  %v746_v47 = vld [vmem:[%s1264_s11 + $0x8] sm:$0xff] }
  0xea   :  { %959 = vmatprep.mubr.msk.f32.mxu0 %vm258_vm13, %v161_v49  ;;  %975 = vmatprep.mubr.msk.f32.mxu1 %vm258_vm13, %v543_v50 }
  0xec   :  { %v53_v49 = vpop.permute.xlu0 %52 }
  0xed   :  { %960 = vmatmul.mubr.msk.f32.vlgmr.msra.gmra.mrb[2].mxu0 %vm258_vm13, %v162_v51  ;;  %976 = vmatmul.mubr.msk.f32.gmra.mrb[6].mxu1 %vm258_vm13, %v544_v52  ;;  %v55_v50 = vmul.f32 %v53_v49, %v1115_v2 }
  0xee   :  { %962 = vmatprep.mubr.msk.f32.mxu0 %vm258_vm13, %v163_v53  ;;  %986 = vmatprep.mubr.msk.f32.mxu1 %vm759_vm14, %v745_v55 }
  0xef   :  { %v57_v51 = vsel %vm56_vm15, %v55_v50, 0.0 }
  0xf0   :  { %v58_v52 = vrot.slane %v57_v51, 4  ;;  %v853_v62 = vpop.permute.xlu0 %852 }
  0xf1   :  { %963 = vmatmul.mubr.msk.f32.gmra.mrb[4].mxu0 %vm258_vm13, %v164_v54  ;;  %v757_v54 = vpop.permute.xlu1 %756 }
  0xf2   :  { %v59_v53 = vadd.f32 %v58_v52, %v57_v51 }
  0xf4   :  { %v60_v55 = vrot.slane %v59_v53, 2 }
  0xf5   :  { %v848_v0 = vpop.permute.xlu1 %847 }
  0xf6   :  { %v61_v61 = vadd.f32 %v60_v55, %v59_v53 }
 0x1bc   :  { %v974_v1 = vpop.f32.mrb[4].mxu1 }
 0x1bd   :  { %v626_v3 = vpop.f32.mrb[5].mxu1 }
 0x1c0   :  { %v961_v9 = vpop.f32.mrb[2].mxu0  ;;  %v977_v10 = vpop.f32.mrb[6].mxu1 }
 0x1c1   :  { %v1005_v12 = vadd.f32 %v974_v1, %v961_v9  ;;  %v440_v13 = vpop.f32.mrb[3].mxu0  ;;  %v636_v14 = vpop.f32.mrb[7].mxu1  ;;  %v65_v9 = vstv %s1265_s2 }
 0x1c2   :  { %v1006_v16 = vadd.f32 %v626_v3, %v440_v13 }
 0x1c3   :  { %v682_v18 = vadd.f32 %v1005_v12, %v678_v11 }
 0x1c4   :  { %v681_v20 = vadd.f32 %v1006_v16, %v677_v15  ;;  %v964_v21 = vpop.f32.mrb[4].mxu0 }
 0x1c5   :  { %v710_v23 = vadd.f32 %v706_v17, %v682_v18  ;;  %v1007_v24 = vadd.f32 %v977_v10, %v964_v21  ;;  %v450_v25 = vpop.f32.mrb[5].mxu0 }
 0x1c6   :  { %v709_v28 = vadd.f32 %v705_v19, %v681_v20  ;;  %v1008_v29 = vadd.f32 %v636_v14, %v450_v25 }
 0x1c7   :  { %v684_v31 = vadd.f32 %v1007_v24, %v680_v22  ;;  %v738_v32 = vadd.f32 %v725_v27, %v710_v23 }
 0x1c8   :  { %v683_v34 = vadd.f32 %v1008_v29, %v679_v26  ;;  %v737_v35 = vadd.f32 %v720_v5, %v709_v28  ;;  %v62_v5 = vrot.slane %v61_v61, 1 }
 0x1c9   :  { %v712_v36 = vadd.f32 %v708_v30, %v684_v31  ;;  %v742_v37 = vmax.f32 %v738_v32, 0.0 }
 0x1ca   :  { %v711_v39 = vadd.f32 %v707_v33, %v683_v34  ;;  %v741_v40 = vmax.f32 %v737_v35, 0.0  ;;  %v63_v7 = vadd.f32 %v62_v5, %v61_v61 }
 0x1cb   :  { %v740_v41 = vadd.f32 %v735_v38, %v712_v36 }
 0x1cc   :  { %v997_v42 = vpack.c.bf16 %v742_v37, %v741_v40  ;;  %v739_v43 = vadd.f32 %v730_v4, %v711_v39  ;;  %v66_v11 = vadd.f32 %v65_v9, %v63_v7 }
 0x1cd   :  { %v744_v44 = vmax.f32 %v740_v41, 0.0 }
 0x1ce   :  { %998 = vmatprep.subr.bf16.mxu1 %v997_v42  ;;  %v743_v45 = vmax.f32 %v739_v43, 0.0  ;;  %v67_v14 = vmax.f32 %v66_v11, 0.0 }
 0x1cf   :  { %1000 = vmatpush3.bf16.msra.mxu1 %v997_v42 }
 0x1d0   :  { %v1001_v46 = vpack.c.bf16 %v744_v44, %v743_v45 }
 0x1d2   :  { %1002 = vmatprep.subr.bf16.mxu1 %v1001_v46 }
 0x1d3   :  { %1004 = vmatpush3.bf16.msra.mxu1 %v1001_v46 }
 0x1d6   :  { %987 = vmatmul.mubr.msk.f32.vlgmr.msra.gmra.mrb[8].mxu1 %vm759_vm14, %v746_v47 }
 0x2a9   :  { %v988_v56 = vpop.f32.mrb[8].mxu1 }
 0x2aa   :  { %v838_v57 = vadd.f32 %v988_v56, %v757_v54  ;;  %v832_v58 = vpop.f32.mrb[9].mxu1 }
 0x2ab   :  { %v833_v59 = vadd.f32 %v832_v58, %v752_v48 }
 0x2ac   :  { %v842_v60 = vmax.f32 %v838_v57, 0.0 }
 0x2ad   :  { %v841_v63 = vmax.f32 %v833_v59, 0.0 }
 0x2ae   :  { %v856_v1 = vmul.f32 %v853_v62, %v842_v60 }
 0x2af   :  { %v855_v3 = vmul.f32 %v848_v0, %v841_v63 }
 0x2b1   :  { %v857_v6 = vadd.f32 %v856_v1, %v855_v3 }
 0x2b3   :  { %v858_v2 = vrot.slane %v857_v6, 4 }
 0x2b5   :  { %v859_v8 = vadd.f32 %v858_v2, %v857_v6 }
 0x2b7   :  { %v860_v10 = vrot.slane %v859_v8, 2 }
 0x2b9   :  { %v861_v12 = vadd.f32 %v860_v10, %v859_v8 }
 0x2bb   :  { %v862_v13 = vrot.slane %v861_v12, 1 }
 0x2bd   :  { %v863_v15 = vadd.f32 %v862_v13, %v861_v12 }
 0x2bf   :  { %v864_v16 = vadd.f32 %v863_v15, %v67_v14 }
 0x2c1   :  { %v865_v17 = vsub.f32 0.0, %v864_v16 }
 0x2c3   :  { %v866_v18 = vmul.f32 1.442695, %v865_v17 }
 0x2c5   :  { %1027 = vpow2.f32 %v866_v18 }
 0x2cf   :  { %v1028_v19 = vpop.eup %1027 }
 0x2d0   :  { %v868_v4 = vadd.f32 1.0, %v1028_v19 }
 0x2d2   :  { %1029 = vrcp.f32 %v868_v4 }
 0x2dc   :  { %v1030_v20 = vpop.eup %1029 }
 0x2dd   :  { %871 = vst [vmem:[%s1266_s14] sm:$0x1] %v1030_v20 }

</bundles_post_ra>
